<compile_context>
chip_gen: v5e
topology: v5e:2x2
jax: 0.10.0
libtpu: 0.0.40
codegen_flags: <defaults>
</compile_context>

<pallas_src>
import functools

import numpy as np
import jax
import jax.numpy as jnp
from jax.experimental import pallas as pl
from jax.experimental.pallas import tpu as pltpu


def _pick_group(S, B, target_rows=8):
    """Smallest divisor G of S such that G*B >= target_rows (fills f32 vreg sublanes)."""
    if B >= target_rows:
        return 1
    need = -(-target_rows // B)
    for g in range(need, S + 1):
        if S % g == 0:
            return g
    return S


def _dino_loss_kernel(teacher_hbm_ref, student_ref, center_ref,
                      ce_all_ref, ce_diag_ref, ent_ref, center_out_ref,
                      qsum_ref, qdiag_ref,
                      *, T, B, G, T_steps, steps_per_core,
                      inv_teacher_temp, inv_student_temp, center_momentum,
                      compute_entropy, compute_diag):
    s_local = pl.program_id(1)                               # step within this core
    i = pl.program_id(0) * steps_per_core + s_local          # global student-group index

    # ---- one-time (per core) teacher pass: softmax -> qsum/qdiag, entropy, center EMA ----
    @pl.when(s_local == 0)
    def _():
        ce_all_ref[...] = jnp.zeros_like(ce_all_ref)
        ce_diag_ref[...] = jnp.zeros_like(ce_diag_ref)
        if not compute_entropy:
            ent_ref[...] = jnp.zeros_like(ent_ref)

        def teacher_pass(traw):
            # Single read of the teacher tensor; the raw buffer is freed after this scope.
            pltpu.sync_copy(teacher_hbm_ref, traw)
            t3 = traw[...].astype(jnp.float32)                # (T, B, D)
            center = center_ref[...]                          # (1, D)

            tl = (t3 - center) * inv_teacher_temp
            tl = tl - jnp.max(tl, axis=-1, keepdims=True)
            te = jnp.exp(tl)
            q = te / jnp.sum(te, axis=-1, keepdims=True)      # exact denominator

            # qsum[b, d] = sum_t q[t, b, d], replicated G times to match grouped rows.
            qsum = jnp.sum(q, axis=0).astype(qsum_ref.dtype)  # (B, D)
            for g in range(G):
                qsum_ref[g * B:(g + 1) * B, :] = qsum

            if compute_diag:
                # Cache q in the grouped student layout for the diagonal (t == v) terms.
                zero = jnp.zeros((B, q.shape[-1]), jnp.float32)
                for ts in range(T_steps):
                    for g in range(G):
                        idx = ts * G + g
                        blk = q[idx] if idx < T else zero
                        qdiag_ref[ts, g * B:(g + 1) * B, :] = blk.astype(qdiag_ref.dtype)

            if compute_entropy:
                # Matches the PyTorch reference: log_softmax applied to the probs q.
                qs = q - jnp.max(q, axis=-1, keepdims=True)
                q_logp = qs - jnp.log(jnp.sum(jnp.exp(qs), axis=-1, keepdims=True))
                ent_rows = jnp.sum(-q * q_logp, axis=-1)      # (T, B)
                ent_ref[0] = jnp.sum(ent_rows, keepdims=True)

            # update_center EMA from the raw teacher output (fused into the single read).
            col = jnp.sum(t3, axis=0)                         # (B, D)
            batch_center = jnp.sum(col, axis=0, keepdims=True) * (1.0 / (T * B))
            center_out_ref[0] = (center * center_momentum
                                 + batch_center * (1.0 - center_momentum))

        pl.run_scoped(teacher_pass,
                      pltpu.VMEM(teacher_hbm_ref.shape, teacher_hbm_ref.dtype))

    # ---- hot path: one group of G student chunks per grid step (pipelined DMA) ----
    sb = student_ref[0].astype(jnp.float32)                   # (G*B, D)
    sl = sb * inv_student_temp
    sl = sl - jnp.max(sl, axis=-1, keepdims=True)
    s_logp = sl - jnp.log(jnp.sum(jnp.exp(sl), axis=-1, keepdims=True))

    # All teacher chunks at once via the precomputed Sigma_t q (review #1).
    prod = qsum_ref[...].astype(jnp.float32) * s_logp
    ce_all_ref[0] += jnp.sum(prod, keepdims=True)

    if compute_diag:
        # t == v contributions: only the first ceil(T/G) groups can have any.
        for ts in range(T_steps):
            @pl.when(i == ts)
            def _(ts=ts):
                qd = qdiag_ref[ts].astype(jnp.float32)        # (G*B, D)
                ce_diag_ref[0] += jnp.sum(qd * s_logp, keepdims=True)


def _dino_pallas_call(teacher_tbd, student_grp, center, *,
                      T, B, G, NC, steps_per_core,
                      teacher_temp, student_temp, center_momentum,
                      compute_entropy, compute_diag):
    D = teacher_tbd.shape[-1]
    T_steps = -(-T // G)

    kernel = functools.partial(
        _dino_loss_kernel, T=T, B=B, G=G, T_steps=T_steps,
        steps_per_core=steps_per_core,
        inv_teacher_temp=1.0 / float(teacher_temp),
        inv_student_temp=1.0 / float(student_temp),
        center_momentum=float(center_momentum),
        compute_entropy=bool(compute_entropy),
        compute_diag=bool(compute_diag))

    grid_spec = pltpu.PrefetchScalarGridSpec(
        num_scalar_prefetch=0,
        grid=(NC, steps_per_core),
        in_specs=[
            pl.BlockSpec(memory_space=pl.ANY),                         # teacher (HBM, copied once/core)
            pl.BlockSpec((1, G * B, D),
                         lambda c, s: (c * steps_per_core + s, 0, 0)),  # student: pipelined stream
            pl.BlockSpec((1, D), lambda c, s: (0, 0)),                 # center: resident
        ],
        out_specs=(
            pl.BlockSpec((1, 1, 1), lambda c, s: (c, 0, 0)),   # per-core sum_{t,v,b,d} q*log p_s
            pl.BlockSpec((1, 1, 1), lambda c, s: (c, 0, 0)),   # per-core diagonal part (t == v)
            pl.BlockSpec((1, 1, 1), lambda c, s: (c, 0, 0)),   # per-core teacher entropy
            pl.BlockSpec((1, 1, D), lambda c, s: (c, 0, 0)),   # per-core updated center
        ),
        scratch_shapes=[
            pltpu.VMEM((G * B, D), jnp.bfloat16),              # Sigma_t q, tiled to group rows
            pltpu.VMEM((T_steps, G * B, D), jnp.bfloat16),     # q in grouped layout (diag)
        ])

    in_bytes = int(np.dtype(teacher_tbd.dtype).itemsize)
    s_bytes = int(np.dtype(student_grp.dtype).itemsize)
    S_tot = NC * steps_per_core * G
    est_vmem = (2 * G * B * D * s_bytes              # double-buffered student tile
                + T * B * D * in_bytes               # scoped raw teacher (step 0 only)
                + (T_steps + 1) * G * B * D * 2      # bf16 scratches
                + 8 * max(T * B * D, G * B * D) * 4  # f32 temporaries headroom
                + 16 * D * 4)                        # center blocks / small outputs
    vmem_limit = int(min(max(2 * est_vmem, 32 << 20), 64 << 20))

    cost = pl.CostEstimate(
        flops=int(S_tot * B * D * 8 + T * B * D * 16),
        transcendentals=int(S_tot * B * D + 3 * T * B * D),
        bytes_accessed=int(S_tot * B * D * s_bytes + T * B * D * in_bytes + 8 * D * 4))

    return pl.pallas_call(
        kernel,
        out_shape=(jax.ShapeDtypeStruct((NC, 1, 1), jnp.float32),
                   jax.ShapeDtypeStruct((NC, 1, 1), jnp.float32),
                   jax.ShapeDtypeStruct((NC, 1, 1), jnp.float32),
                   jax.ShapeDtypeStruct((NC, 1, D), jnp.float32)),
        grid_spec=grid_spec,
        compiler_params=pltpu.CompilerParams(
            dimension_semantics=("parallel", "arbitrary"),
            vmem_limit_bytes=vmem_limit),
        cost_estimate=cost,
    )(teacher_tbd, student_grp, center)


class DINOLossPallas:
    """JAX/Pallas port of the PyTorch DINOLoss forward pass."""

    def __init__(self, out_dim, ncrops, warmup_teacher_temp, teacher_temp,
                 warmup_teacher_temp_epochs, nepochs,
                 student_temp=0.1, center_momentum=0.9):
        self.student_temp = student_temp
        self.center_momentum = center_momentum
        self.ncrops = ncrops
        self.center = jnp.zeros((1, out_dim), jnp.float32)   # register_buffer('center')
        self.teacher_temp_schedule = np.concatenate((
            np.linspace(warmup_teacher_temp, teacher_temp, warmup_teacher_temp_epochs),
            np.ones(nepochs - warmup_teacher_temp_epochs) * teacher_temp))

    def forward(self, student_output, teacher_output, epoch, n_global=2, n_local=8,
                seq_length=2, return_entropy_kl=True, local2glb_only=False):
        assert student_output.ndim == 2 and teacher_output.ndim == 2
        temp = float(self.teacher_temp_schedule[epoch])
        T = n_global * seq_length
        S = (n_local if local2glb_only else (n_global + n_local)) * seq_length
        Nt, D = teacher_output.shape
        Ns, _ = student_output.shape
        B = Nt // T
        assert Nt == T * B and Ns == S * B
        # NOTE: the glb_local2glb diagonal skip assumes student chunks 0..T-1 are the
        # same crops, in the same order, as the teacher chunks (true for this layout).

        G = _pick_group(S, B)                       # chunks per grid step (sublane fill)
        S_steps = S // G
        NC = 2 if (S_steps >= 2 and S_steps % 2 == 0) else 1   # megacore split (v7x)
        steps_per_core = S_steps // NC

        # Free, contiguous reshapes only — no transpose and no dtype cast on the wrapper.
        teacher_tbd = teacher_output.reshape(T, B, D)
        student_grp = student_output.reshape(S_steps, G * B, D)

        compute_diag = not local2glb_only
        compute_entropy = bool(local2glb_only and return_entropy_kl)

        ce_all_p, ce_diag_p, ent_p, center_p = _dino_pallas_call(
            teacher_tbd, student_grp, self.center,
            T=T, B=B, G=G, NC=NC, steps_per_core=steps_per_core,
            teacher_temp=temp, student_temp=self.student_temp,
            center_momentum=self.center_momentum,
            compute_entropy=compute_entropy, compute_diag=compute_diag)

        # TODO(synk): dist.all_reduce of batch_center not implemented (single-device EMA).
        self.center = center_p[0]                   # (1, D); identical on every core

        ce_all = jnp.sum(ce_all_p)                  # sum the per-core partials

        if local2glb_only:
            n_terms = T * S
            total_ce = -ce_all / (B * n_terms)
            if return_entropy_kl:
                total_ent = ent_p[0, 0, 0] / (B * T)
                total_kl = total_ce - total_ent
                return total_ce, total_ent, total_kl
            return total_ce
        else:
            ce_diag = jnp.sum(ce_diag_p)
            n_terms = T * S - min(T, S)
            total = -(ce_all - ce_diag) / (B * n_terms)
            # NOTE: in the PyTorch reference, return_entropy_kl=True on this branch would
            # raise NameError (loss_entropy undefined), so only the loss is returned here.
            return total


def _reference(student_output, teacher_output, center, temp, student_temp,
               center_momentum, T, S, local2glb_only):
    """Pure-JAX transliteration of the PyTorch forward, for verification."""
    student_out = student_output / student_temp
    s_chunks = jnp.split(student_out, S, axis=0)
    teacher_soft = jax.nn.softmax((teacher_output - center) / temp, axis=-1)
    t_chunks = jnp.split(teacher_soft, T, axis=0)
    if local2glb_only:
        tot_ce = tot_ent = tot_kl = 0.0
        n = 0
        for q in t_chunks:
            for v in range(S):
                ce = jnp.mean(jnp.sum(-q * jax.nn.log_softmax(s_chunks[v], axis=-1), axis=-1))
                ent = jnp.mean(jnp.sum(-q * jax.nn.log_softmax(q, axis=-1), axis=-1))
                tot_ce += ce
                tot_ent += ent
                tot_kl += ce - ent
                n += 1
        out = (tot_ce / n, tot_ent / n, tot_kl / n)
    else:
        tot = 0.0
        n = 0
        for iq, q in enumerate(t_chunks):
            for v in range(S):
                if v == iq:
                    continue
                tot += jnp.mean(jnp.sum(-q * jax.nn.log_softmax(s_chunks[v], axis=-1), axis=-1))
                n += 1
        out = tot / n
    batch_center = jnp.sum(teacher_output, axis=0, keepdims=True) / teacher_output.shape[0]
    new_center = center * center_momentum + batch_center * (1.0 - center_momentum)
    return out, new_center


if __name__ == "__main__":
    out_dim = 128
    n_global, n_local, seq_length = 2, 8, 2
    B = 4
    T = n_global * seq_length                     # 4 teacher chunks
    S_full = (n_global + n_local) * seq_length    # 20 student chunks (default path)
    S_local = n_local * seq_length                # 16 student chunks (local2glb_only path)

    key = jax.random.PRNGKey(0)
    k1, k2, k3 = jax.random.split(key, 3)
    student_full = jax.random.normal(k1, (S_full * B, out_dim), jnp.float32)
    teacher = jax.random.normal(k2, (T * B, out_dim), jnp.float32)
    student_local = jax.random.normal(k3, (S_local * B, out_dim), jnp.float32)

    loss_mod = DINOLossPallas(out_dim=out_dim, ncrops=n_global + n_local,
                              warmup_teacher_temp=0.04, teacher_temp=0.07,
                              warmup_teacher_temp_epochs=5, nepochs=20)
    epoch = 3
    temp = float(loss_mod.teacher_temp_schedule[epoch])

    # Path 1: default DINO loss (glb_local2glb), return_entropy_kl=False.
    center0 = loss_mod.center
    total = loss_mod.forward(student_full, teacher, epoch, n_global=n_global,
                             n_local=n_local, seq_length=seq_length,
                             return_entropy_kl=False, local2glb_only=False)
    jax.block_until_ready(total)
    ref_total, ref_center = _reference(student_full, teacher, center0, temp,
                                       loss_mod.student_temp, loss_mod.center_momentum,
                                       T, S_full, False)
    np.testing.assert_allclose(np.asarray(total), np.asarray(ref_total), rtol=2e-2, atol=2e-2)
    np.testing.assert_allclose(np.asarray(loss_mod.center), np.asarray(ref_center),
                               rtol=1e-4, atol=1e-5)

    # Path 2: local2glb_only=True with (loss, entropy, KL) outputs.
    center1 = loss_mod.center
    ce, ent, kl = loss_mod.forward(student_local, teacher, epoch, n_global=n_global,
                                   n_local=n_local, seq_length=seq_length,
                                   return_entropy_kl=True, local2glb_only=True)
    jax.block_until_ready((ce, ent, kl))
    (ref_ce, ref_ent, ref_kl), _ = _reference(student_local, teacher, center1, temp,
                                              loss_mod.student_temp, loss_mod.center_momentum,
                                              T, S_local, True)
    np.testing.assert_allclose(np.asarray(ce), np.asarray(ref_ce), rtol=2e-2, atol=2e-2)
    np.testing.assert_allclose(np.asarray(ent), np.asarray(ref_ent), rtol=2e-2, atol=2e-2)
    np.testing.assert_allclose(np.asarray(kl), np.asarray(ref_kl), rtol=2e-2, atol=2e-2)

    print("KERNEL_OK")
</pallas_src>

<mosaic_0001>
module attributes {stable_mosaic.version = 11 : i64} {
  func.func @_dino_loss_kernel(%arg0: i32, %arg1: i32, %arg2: memref<4x4x128xf32, #tpu.memory_space<any>>, %arg3: memref<1x8x128xf32, #tpu.memory_space<vmem>>, %arg4: memref<1x128xf32, #tpu.memory_space<vmem>>, %arg5: memref<1x1x1xf32, #tpu.memory_space<vmem>>, %arg6: memref<1x1x1xf32, #tpu.memory_space<vmem>>, %arg7: memref<1x1x1xf32, #tpu.memory_space<vmem>>, %arg8: memref<1x1x128xf32, #tpu.memory_space<vmem>>, %arg9: memref<8x128xbf16, #tpu.memory_space<vmem>>, %arg10: memref<2x8x128xbf16, #tpu.memory_space<vmem>>) attributes {dimension_semantics = [#tpu.dimension_semantics<parallel>, #tpu.dimension_semantics<arbitrary>], iteration_bounds = array<i64: 2, 5>, scalar_prefetch = 0 : i64, scratch_operands = 2 : i64, tpu.core_type = #tpu.core_type<tc>, window_params = [{}, {transform_indices = @transform_1, window_bounds = array<i64: 1, 8, 128>}, {pipeline_mode = #tpu.pipeline_mode<synchronous>, transform_indices = @transform_2, window_bounds = array<i64: 1, 128>}, {transform_indices = @transform_3, window_bounds = array<i64: 1, 1, 1>}, {transform_indices = @transform_4, window_bounds = array<i64: 1, 1, 1>}, {transform_indices = @transform_5, window_bounds = array<i64: 1, 1, 1>}, {transform_indices = @transform_6, window_bounds = array<i64: 1, 1, 128>}]} {
    %c5_i32 = arith.constant 5 : i32
    %0 = arith.muli %arg0, %c5_i32 : i32
    %1 = arith.addi %0, %arg1 : i32
    %c0_i32 = arith.constant 0 : i32
    %2 = arith.cmpi eq, %arg1, %c0_i32 : i32
    %3 = arith.extui %2 : i1 to i32
    %c0_i32_0 = arith.constant 0 : i32
    %4 = arith.cmpi ne, %3, %c0_i32_0 : i32
    scf.if %4 {
      %cst_17 = arith.constant 0.000000e+00 : f32
      %39 = vector.broadcast %cst_17 : f32 to vector<1x1x1xf32>
      %c0_18 = arith.constant 0 : index
      %c0_19 = arith.constant 0 : index
      %c0_20 = arith.constant 0 : index
      %40 = vector.load %arg5[%c0_18, %c0_19, %c0_20] : memref<1x1x1xf32, #tpu.memory_space<vmem>>, vector<1x1x1xf32>
      tpu.vector_store %arg5[%c0_18, %c0_19, %c0_20], %39 {strides = array<i32>} : memref<1x1x1xf32, #tpu.memory_space<vmem>>, vector<1x1x1xf32>,
      %cst_21 = arith.constant 0.000000e+00 : f32
      %41 = vector.broadcast %cst_21 : f32 to vector<1x1x1xf32>
      %c0_22 = arith.constant 0 : index
      %c0_23 = arith.constant 0 : index
      %c0_24 = arith.constant 0 : index
      %42 = vector.load %arg6[%c0_22, %c0_23, %c0_24] : memref<1x1x1xf32, #tpu.memory_space<vmem>>, vector<1x1x1xf32>
      tpu.vector_store %arg6[%c0_22, %c0_23, %c0_24], %41 {strides = array<i32>} : memref<1x1x1xf32, #tpu.memory_space<vmem>>, vector<1x1x1xf32>,
      %cst_25 = arith.constant 0.000000e+00 : f32
      %43 = vector.broadcast %cst_25 : f32 to vector<1x1x1xf32>
      %c0_26 = arith.constant 0 : index
      %c0_27 = arith.constant 0 : index
      %c0_28 = arith.constant 0 : index
      %44 = vector.load %arg7[%c0_26, %c0_27, %c0_28] : memref<1x1x1xf32, #tpu.memory_space<vmem>>, vector<1x1x1xf32>
      tpu.vector_store %arg7[%c0_26, %c0_27, %c0_28], %43 {strides = array<i32>} : memref<1x1x1xf32, #tpu.memory_space<vmem>>, vector<1x1x1xf32>,
      "tpu.region"() ({
        %alloca = memref.alloca() : memref<4x4x128xf32, #tpu.memory_space<vmem>>
        "tpu.region"() ({
          %103 = tpu.sem_alloc : memref<!tpu.dma_semaphore, #tpu.memory_space<semaphore_mem>>
          tpu.enqueue_dma source(%arg2 : memref<4x4x128xf32, #tpu.memory_space<any>>) target(%alloca : memref<4x4x128xf32, #tpu.memory_space<vmem>>) target_semaphore(%103 : memref<!tpu.dma_semaphore, #tpu.memory_space<semaphore_mem>>)
          tpu.wait_dma2 semaphore(%103 : memref<!tpu.dma_semaphore, #tpu.memory_space<semaphore_mem>>) src(%arg2 : memref<4x4x128xf32, #tpu.memory_space<any>>) dst(%alloca : memref<4x4x128xf32, #tpu.memory_space<vmem>>)
          tpu.yield
        }) : () -> ()
        %c0_29 = arith.constant 0 : index
        %c0_30 = arith.constant 0 : index
        %c0_31 = arith.constant 0 : index
        %45 = vector.load %alloca[%c0_29, %c0_30, %c0_31] : memref<4x4x128xf32, #tpu.memory_space<vmem>>, vector<4x4x128xf32>
        %c0_32 = arith.constant 0 : index
        %c0_33 = arith.constant 0 : index
        %46 = vector.load %arg4[%c0_32, %c0_33] : memref<1x128xf32, #tpu.memory_space<vmem>>, vector<1x128xf32>
        %47 = vector.shape_cast %46 : vector<1x128xf32> to vector<1x1x128xf32>
        %48 = vector.broadcast %47 : vector<1x1x128xf32> to vector<4x4x128xf32>
        %49 = arith.subf %45, %48 : vector<4x4x128xf32>
        %cst_34 = arith.constant 1.600000e+01 : f32
        %50 = vector.broadcast %cst_34 : f32 to vector<4x4x128xf32>
        %51 = arith.mulf %49, %50 : vector<4x4x128xf32>
        %cst_35 = arith.constant dense<0xFF800000> : vector<4x4xf32>
        %52 = vector.multi_reduction <maximumf>, %51, %cst_35 [2] : vector<4x4x128xf32> to vector<4x4xf32>
        %53 = vector.shape_cast %52 : vector<4x4xf32> to vector<4x4x1xf32>
        %54 = vector.broadcast %53 : vector<4x4x1xf32> to vector<4x4x128xf32>
        %55 = arith.subf %51, %54 : vector<4x4x128xf32>
        %56 = math.exp %55 : vector<4x4x128xf32>
        %cst_36 = arith.constant dense<0.000000e+00> : vector<4x4xf32>
        %57 = vector.multi_reduction <add>, %56, %cst_36 [2] : vector<4x4x128xf32> to vector<4x4xf32>
        %58 = vector.shape_cast %57 : vector<4x4xf32> to vector<4x4x1xf32>
        %59 = vector.broadcast %58 : vector<4x4x1xf32> to vector<4x4x128xf32>
        %60 = arith.divf %56, %59 : vector<4x4x128xf32>
        %cst_37 = arith.constant dense<0.000000e+00> : vector<4x128xf32>
        %61 = vector.multi_reduction <add>, %60, %cst_37 [0] : vector<4x4x128xf32> to vector<4x128xf32>
        %62 = arith.truncf %61 : vector<4x128xf32> to vector<4x128xbf16>
        %c0_38 = arith.constant 0 : index
        %c0_39 = arith.constant 0 : index
        %63 = vector.load %arg9[%c0_38, %c0_39] : memref<8x128xbf16, #tpu.memory_space<vmem>>, vector<4x128xbf16>
        tpu.vector_store %arg9[%c0_38, %c0_39], %62 {strides = array<i32>} : memref<8x128xbf16, #tpu.memory_space<vmem>>, vector<4x128xbf16>,
        %c4 = arith.constant 4 : index
        %c0_40 = arith.constant 0 : index
        %64 = vector.load %arg9[%c4, %c0_40] : memref<8x128xbf16, #tpu.memory_space<vmem>>, vector<4x128xbf16>
        tpu.vector_store %arg9[%c4, %c0_40], %62 {strides = array<i32>} : memref<8x128xbf16, #tpu.memory_space<vmem>>, vector<4x128xbf16>,
        %cst_41 = arith.constant 0.000000e+00 : f32
        %65 = vector.broadcast %cst_41 : f32 to vector<4x128xf32>
        %66 = vector.extract_strided_slice %60 {offsets = [0, 0, 0], sizes = [1, 4, 128], strides = [1, 1, 1]} : vector<4x4x128xf32> to vector<1x4x128xf32>
        %67 = vector.shape_cast %66 : vector<1x4x128xf32> to vector<4x128xf32>
        %68 = arith.truncf %67 : vector<4x128xf32> to vector<4x128xbf16>
        %c0_42 = arith.constant 0 : index
        %c0_43 = arith.constant 0 : index
        %c0_44 = arith.constant 0 : index
        %69 = vector.load %arg10[%c0_42, %c0_43, %c0_44] : memref<2x8x128xbf16, #tpu.memory_space<vmem>>, vector<1x4x128xbf16>
        %70 = vector.shape_cast %69 : vector<1x4x128xbf16> to vector<4x128xbf16>
        %71 = vector.shape_cast %68 : vector<4x128xbf16> to vector<1x4x128xbf16>
        tpu.vector_store %arg10[%c0_42, %c0_43, %c0_44], %71 {strides = array<i32>} : memref<2x8x128xbf16, #tpu.memory_space<vmem>>, vector<1x4x128xbf16>,
        %72 = vector.extract_strided_slice %60 {offsets = [1, 0, 0], sizes = [1, 4, 128], strides = [1, 1, 1]} : vector<4x4x128xf32> to vector<1x4x128xf32>
        %73 = vector.shape_cast %72 : vector<1x4x128xf32> to vector<4x128xf32>
        %74 = arith.truncf %73 : vector<4x128xf32> to vector<4x128xbf16>
        %c0_45 = arith.constant 0 : index
        %c4_46 = arith.constant 4 : index
        %c0_47 = arith.constant 0 : index
        %75 = vector.load %arg10[%c0_45, %c4_46, %c0_47] : memref<2x8x128xbf16, #tpu.memory_space<vmem>>, vector<1x4x128xbf16>
        %76 = vector.shape_cast %75 : vector<1x4x128xbf16> to vector<4x128xbf16>
        %77 = vector.shape_cast %74 : vector<4x128xbf16> to vector<1x4x128xbf16>
        tpu.vector_store %arg10[%c0_45, %c4_46, %c0_47], %77 {strides = array<i32>} : memref<2x8x128xbf16, #tpu.memory_space<vmem>>, vector<1x4x128xbf16>,
        %78 = vector.extract_strided_slice %60 {offsets = [2, 0, 0], sizes = [1, 4, 128], strides = [1, 1, 1]} : vector<4x4x128xf32> to vector<1x4x128xf32>
        %79 = vector.shape_cast %78 : vector<1x4x128xf32> to vector<4x128xf32>
        %80 = arith.truncf %79 : vector<4x128xf32> to vector<4x128xbf16>
        %c1 = arith.constant 1 : index
        %c0_48 = arith.constant 0 : index
        %c0_49 = arith.constant 0 : index
        %81 = vector.load %arg10[%c1, %c0_48, %c0_49] : memref<2x8x128xbf16, #tpu.memory_space<vmem>>, vector<1x4x128xbf16>
        %82 = vector.shape_cast %81 : vector<1x4x128xbf16> to vector<4x128xbf16>
        %83 = vector.shape_cast %80 : vector<4x128xbf16> to vector<1x4x128xbf16>
        tpu.vector_store %arg10[%c1, %c0_48, %c0_49], %83 {strides = array<i32>} : memref<2x8x128xbf16, #tpu.memory_space<vmem>>, vector<1x4x128xbf16>,
        %84 = vector.extract_strided_slice %60 {offsets = [3, 0, 0], sizes = [1, 4, 128], strides = [1, 1, 1]} : vector<4x4x128xf32> to vector<1x4x128xf32>
        %85 = vector.shape_cast %84 : vector<1x4x128xf32> to vector<4x128xf32>
        %86 = arith.truncf %85 : vector<4x128xf32> to vector<4x128xbf16>
        %c1_50 = arith.constant 1 : index
        %c4_51 = arith.constant 4 : index
        %c0_52 = arith.constant 0 : index
        %87 = vector.load %arg10[%c1_50, %c4_51, %c0_52] : memref<2x8x128xbf16, #tpu.memory_space<vmem>>, vector<1x4x128xbf16>
        %88 = vector.shape_cast %87 : vector<1x4x128xbf16> to vector<4x128xbf16>
        %89 = vector.shape_cast %86 : vector<4x128xbf16> to vector<1x4x128xbf16>
        tpu.vector_store %arg10[%c1_50, %c4_51, %c0_52], %89 {strides = array<i32>} : memref<2x8x128xbf16, #tpu.memory_space<vmem>>, vector<1x4x128xbf16>,
        %cst_53 = arith.constant dense<0.000000e+00> : vector<4x128xf32>
        %90 = vector.multi_reduction <add>, %45, %cst_53 [0] : vector<4x4x128xf32> to vector<4x128xf32>
        %cst_54 = arith.constant dense<0.000000e+00> : vector<128xf32>
        %91 = vector.multi_reduction <add>, %90, %cst_54 [0] : vector<4x128xf32> to vector<128xf32>
        %92 = vector.shape_cast %91 : vector<128xf32> to vector<1x128xf32>
        %cst_55 = arith.constant 6.250000e-02 : f32
        %93 = vector.broadcast %cst_55 : f32 to vector<1x128xf32>
        %94 = arith.mulf %92, %93 : vector<1x128xf32>
        %cst_56 = arith.constant 0.899999976 : f32
        %95 = vector.broadcast %cst_56 : f32 to vector<1x128xf32>
        %96 = arith.mulf %46, %95 : vector<1x128xf32>
        %cst_57 = arith.constant 1.000000e-01 : f32
        %97 = vector.broadcast %cst_57 : f32 to vector<1x128xf32>
        %98 = arith.mulf %94, %97 : vector<1x128xf32>
        %99 = arith.addf %96, %98 : vector<1x128xf32>
        %c0_58 = arith.constant 0 : index
        %c0_59 = arith.constant 0 : index
        %c0_60 = arith.constant 0 : index
        %100 = vector.load %arg8[%c0_58, %c0_59, %c0_60] : memref<1x1x128xf32, #tpu.memory_space<vmem>>, vector<1x1x128xf32>
        %101 = vector.shape_cast %100 : vector<1x1x128xf32> to vector<1x128xf32>
        %102 = vector.shape_cast %99 : vector<1x128xf32> to vector<1x1x128xf32>
        tpu.vector_store %arg8[%c0_58, %c0_59, %c0_60], %102 {strides = array<i32>} : memref<1x1x128xf32, #tpu.memory_space<vmem>>, vector<1x1x128xf32>,
        tpu.yield
      }) : () -> ()
    } else {
    }
    %c0 = arith.constant 0 : index
    %c0_1 = arith.constant 0 : index
    %c0_2 = arith.constant 0 : index
    %5 = vector.load %arg3[%c0, %c0_1, %c0_2] : memref<1x8x128xf32, #tpu.memory_space<vmem>>, vector<1x8x128xf32>
    %6 = vector.shape_cast %5 : vector<1x8x128xf32> to vector<8x128xf32>
    %cst = arith.constant 1.000000e+01 : f32
    %7 = vector.broadcast %cst : f32 to vector<8x128xf32>
    %8 = arith.mulf %6, %7 : vector<8x128xf32>
    %cst_3 = arith.constant dense<0xFF800000> : vector<8xf32>
    %9 = vector.multi_reduction <maximumf>, %8, %cst_3 [1] : vector<8x128xf32> to vector<8xf32>
    %10 = vector.shape_cast %9 : vector<8xf32> to vector<8x1xf32>
    %11 = vector.broadcast %10 : vector<8x1xf32> to vector<8x128xf32>
    %12 = arith.subf %8, %11 : vector<8x128xf32>
    %13 = math.exp %12 : vector<8x128xf32>
    %cst_4 = arith.constant dense<0.000000e+00> : vector<8xf32>
    %14 = vector.multi_reduction <add>, %13, %cst_4 [1] : vector<8x128xf32> to vector<8xf32>
    %15 = vector.shape_cast %14 : vector<8xf32> to vector<8x1xf32>
    %16 = math.log %15 : vector<8x1xf32>
    %17 = vector.broadcast %16 : vector<8x1xf32> to vector<8x128xf32>
    %18 = arith.subf %12, %17 : vector<8x128xf32>
    %c0_5 = arith.constant 0 : index
    %c0_6 = arith.constant 0 : index
    %19 = vector.load %arg9[%c0_5, %c0_6] : memref<8x128xbf16, #tpu.memory_space<vmem>>, vector<8x128xbf16>
    %20 = arith.extf %19 : vector<8x128xbf16> to vector<8x128xf32>
    %21 = arith.mulf %20, %18 : vector<8x128xf32>
    %c0_7 = arith.constant 0 : index
    %c0_8 = arith.constant 0 : index
    %c0_9 = arith.constant 0 : index
    %22 = vector.load %arg5[%c0_7, %c0_8, %c0_9] : memref<1x1x1xf32, #tpu.memory_space<vmem>>, vector<1x1x1xf32>
    %23 = vector.shape_cast %22 : vector<1x1x1xf32> to vector<1x1xf32>
    %24 = vector.shape_cast %21 : vector<8x128xf32> to vector<1x8x128xf32>
    %cst_10 = arith.constant dense<0.000000e+00> : vector<1xf32>
    %25 = vector.multi_reduction <add>, %24, %cst_10 [1, 2] : vector<1x8x128xf32> to vector<1xf32>
    %26 = vector.shape_cast %25 : vector<1xf32> to vector<1x1x1xf32>
    %27 = vector.extract %26[0, 0, 0] : f32 from vector<1x1x1xf32>
    %28 = vector.broadcast %27 : f32 to vector<1x1xf32>
    %29 = arith.addf %23, %28 : vector<1x1xf32>
    %c0_11 = arith.constant 0 : index
    %c0_12 = arith.constant 0 : index
    %c0_13 = arith.constant 0 : index
    %30 = vector.load %arg5[%c0_11, %c0_12, %c0_13] : memref<1x1x1xf32, #tpu.memory_space<vmem>>, vector<1x1x1xf32>
    %31 = vector.shape_cast %30 : vector<1x1x1xf32> to vector<1x1xf32>
    %32 = vector.shape_cast %29 : vector<1x1xf32> to vector<1x1x1xf32>
    tpu.vector_store %arg5[%c0_11, %c0_12, %c0_13], %32 {strides = array<i32>} : memref<1x1x1xf32, #tpu.memory_space<vmem>>, vector<1x1x1xf32>,
    %c0_i32_14 = arith.constant 0 : i32
    %33 = arith.cmpi eq, %1, %c0_i32_14 : i32
    %34 = arith.extui %33 : i1 to i32
    %c0_i32_15 = arith.constant 0 : i32
    %35 = arith.cmpi ne, %34, %c0_i32_15 : i32
    scf.if %35 {
      %c0_17 = arith.constant 0 : index
      %c0_18 = arith.constant 0 : index
      %c0_19 = arith.constant 0 : index
      %39 = vector.load %arg10[%c0_17, %c0_18, %c0_19] : memref<2x8x128xbf16, #tpu.memory_space<vmem>>, vector<1x8x128xbf16>
      %40 = vector.shape_cast %39 : vector<1x8x128xbf16> to vector<8x128xbf16>
      %41 = arith.extf %40 : vector<8x128xbf16> to vector<8x128xf32>
      %c0_20 = arith.constant 0 : index
      %c0_21 = arith.constant 0 : index
      %c0_22 = arith.constant 0 : index
      %42 = vector.load %arg6[%c0_20, %c0_21, %c0_22] : memref<1x1x1xf32, #tpu.memory_space<vmem>>, vector<1x1x1xf32>
      %43 = vector.shape_cast %42 : vector<1x1x1xf32> to vector<1x1xf32>
      %44 = arith.mulf %41, %18 : vector<8x128xf32>
      %45 = vector.shape_cast %44 : vector<8x128xf32> to vector<1x8x128xf32>
      %cst_23 = arith.constant dense<0.000000e+00> : vector<1xf32>
      %46 = vector.multi_reduction <add>, %45, %cst_23 [1, 2] : vector<1x8x128xf32> to vector<1xf32>
      %47 = vector.shape_cast %46 : vector<1xf32> to vector<1x1x1xf32>
      %48 = vector.extract %47[0, 0, 0] : f32 from vector<1x1x1xf32>
      %49 = vector.broadcast %48 : f32 to vector<1x1xf32>
      %50 = arith.addf %43, %49 : vector<1x1xf32>
      %c0_24 = arith.constant 0 : index
      %c0_25 = arith.constant 0 : index
      %c0_26 = arith.constant 0 : index
      %51 = vector.load %arg6[%c0_24, %c0_25, %c0_26] : memref<1x1x1xf32, #tpu.memory_space<vmem>>, vector<1x1x1xf32>
      %52 = vector.shape_cast %51 : vector<1x1x1xf32> to vector<1x1xf32>
      %53 = vector.shape_cast %50 : vector<1x1xf32> to vector<1x1x1xf32>
      tpu.vector_store %arg6[%c0_24, %c0_25, %c0_26], %53 {strides = array<i32>} : memref<1x1x1xf32, #tpu.memory_space<vmem>>, vector<1x1x1xf32>,
    } else {
    }
    %c1_i32 = arith.constant 1 : i32
    %36 = arith.cmpi eq, %1, %c1_i32 : i32
    %37 = arith.extui %36 : i1 to i32
    %c0_i32_16 = arith.constant 0 : i32
    %38 = arith.cmpi ne, %37, %c0_i32_16 : i32
    scf.if %38 {
      %c1 = arith.constant 1 : index
      %c0_17 = arith.constant 0 : index
      %c0_18 = arith.constant 0 : index
      %39 = vector.load %arg10[%c1, %c0_17, %c0_18] : memref<2x8x128xbf16, #tpu.memory_space<vmem>>, vector<1x8x128xbf16>
      %40 = vector.shape_cast %39 : vector<1x8x128xbf16> to vector<8x128xbf16>
      %41 = arith.extf %40 : vector<8x128xbf16> to vector<8x128xf32>
      %c0_19 = arith.constant 0 : index
      %c0_20 = arith.constant 0 : index
      %c0_21 = arith.constant 0 : index
      %42 = vector.load %arg6[%c0_19, %c0_20, %c0_21] : memref<1x1x1xf32, #tpu.memory_space<vmem>>, vector<1x1x1xf32>
      %43 = vector.shape_cast %42 : vector<1x1x1xf32> to vector<1x1xf32>
      %44 = arith.mulf %41, %18 : vector<8x128xf32>
      %45 = vector.shape_cast %44 : vector<8x128xf32> to vector<1x8x128xf32>
      %cst_22 = arith.constant dense<0.000000e+00> : vector<1xf32>
      %46 = vector.multi_reduction <add>, %45, %cst_22 [1, 2] : vector<1x8x128xf32> to vector<1xf32>
      %47 = vector.shape_cast %46 : vector<1xf32> to vector<1x1x1xf32>
      %48 = vector.extract %47[0, 0, 0] : f32 from vector<1x1x1xf32>
      %49 = vector.broadcast %48 : f32 to vector<1x1xf32>
      %50 = arith.addf %43, %49 : vector<1x1xf32>
      %c0_23 = arith.constant 0 : index
      %c0_24 = arith.constant 0 : index
      %c0_25 = arith.constant 0 : index
      %51 = vector.load %arg6[%c0_23, %c0_24, %c0_25] : memref<1x1x1xf32, #tpu.memory_space<vmem>>, vector<1x1x1xf32>
      %52 = vector.shape_cast %51 : vector<1x1x1xf32> to vector<1x1xf32>
      %53 = vector.shape_cast %50 : vector<1x1xf32> to vector<1x1x1xf32>
      tpu.vector_store %arg6[%c0_23, %c0_24, %c0_25], %53 {strides = array<i32>} : memref<1x1x1xf32, #tpu.memory_space<vmem>>, vector<1x1x1xf32>,
    } else {
    }
    return
  }
  func.func @transform_1(%arg0: i32, %arg1: i32) -> (i32, i32, i32) {
    %c5_i32 = arith.constant 5 : i32
    %0 = arith.muli %arg0, %c5_i32 : i32
    %1 = arith.addi %0, %arg1 : i32
    %c0_i32 = arith.constant 0 : i32
    %c0_i32_0 = arith.constant 0 : i32
    %c0_i32_1 = arith.constant 0 : i32
    return %1, %c0_i32, %c0_i32_0 : i32, i32, i32
  }
  func.func @transform_2(%arg0: i32, %arg1: i32) -> (i32, i32) {
    %c0_i32 = arith.constant 0 : i32
    %c0_i32_0 = arith.constant 0 : i32
    %c0_i32_1 = arith.constant 0 : i32
    return %c0_i32, %c0_i32_0 : i32, i32
  }
  func.func @transform_3(%arg0: i32, %arg1: i32) -> (i32, i32, i32) {
    %c0_i32 = arith.constant 0 : i32
    %c0_i32_0 = arith.constant 0 : i32
    %c0_i32_1 = arith.constant 0 : i32
    return %arg0, %c0_i32, %c0_i32_0 : i32, i32, i32
  }
  func.func @transform_4(%arg0: i32, %arg1: i32) -> (i32, i32, i32) {
    %c0_i32 = arith.constant 0 : i32
    %c0_i32_0 = arith.constant 0 : i32
    %c0_i32_1 = arith.constant 0 : i32
    return %arg0, %c0_i32, %c0_i32_0 : i32, i32, i32
  }
  func.func @transform_5(%arg0: i32, %arg1: i32) -> (i32, i32, i32) {
    %c0_i32 = arith.constant 0 : i32
    %c0_i32_0 = arith.constant 0 : i32
    %c0_i32_1 = arith.constant 0 : i32
    return %arg0, %c0_i32, %c0_i32_0 : i32, i32, i32
  }
  func.func @transform_6(%arg0: i32, %arg1: i32) -> (i32, i32, i32) {
    %c0_i32 = arith.constant 0 : i32
    %c0_i32_0 = arith.constant 0 : i32
    %c0_i32_1 = arith.constant 0 : i32
    return %arg0, %c0_i32, %c0_i32_0 : i32, i32, i32
  }
}

</mosaic_0001>

<bundles_post_ra>
// kernel: tpu_custom_call.1
= control target key start
LH: loop header
LB: loop body
LE: loop exit
PB: predicated region body
PF: predicated region fallthrough
CT: control target
= control target key end

     0   :  { %s1320_s0 = inlined_call_operand.hbm [shape: f32[4,4,128], index: 0, kind: input, shape index: {}]   ;;  %s1321_s1 = inlined_call_operand.hbm [shape: f32[10,8,128], index: 1, kind: input, shape index: {}]   ;;  %s1322_s2 = inlined_call_operand.vmem [shape: f32[1,128], index: 2, kind: input, shape index: {}]   ;;  %s1323_s3 = inlined_call_operand.vmem [shape: f32[2,1,1], index: 3, kind: output, shape index: {0}]   ;;  %s1324_s4 = inlined_call_operand.vmem [shape: f32[2,1,1], index: 4, kind: output, shape index: {1}]   ;;  %s1325_s5 = inlined_call_operand.vmem [shape: f32[2,1,1], index: 5, kind: output, shape index: {2}]   ;;  %s1326_s6 = inlined_call_operand.hbm [shape: f32[2,1,128], index: 6, kind: output, shape index: {3}]  }
   0x1   :  { %1332 = sst [smem:[#allocation22_spill]] %s1321_s1 }
   0x2   :  { %1333 = sst [smem:[#allocation23_spill]] %s1326_s6 }
   0x3   :  { %12 = vsyncpa [#allocation5], 0 }
   0x4   :  { %14 = vsyncpa [#allocation5 + $0x1], 0 }
   0x5   :  { %15 = vsyncpa [#allocation6], 0 }
   0x6   :  { %17 = vsyncpa [#allocation6 + $0x1], 0  ;;  %s1072_s21 = smov 0   ;;  %s1074_s22 = smov 0  }
   0x7   :  { %s1076_s23 = smov 0   ;;  %s1078_s24 = smov 0  }
   0x8   :  { %s1080_s25 = smov 0   ;;  %s1082_s26 = smov 0  }
   0x9   :  { %s1084_s27 = smov 0   ;;  %s1086_s28 = smov 0  }
   0xa   :  { %s1088_s29 = smov 0   ;;  %s1090_s30 = smov 0  }
   0xb   :  { %s1092_s7 = smov 0  }
   0xc LB: > { %1334 = sst [smem:[#allocation17_spill]] %s1025_s29  ;;  %s711_s8 = sadd.s32 4294967295, %s1033_s7   ;;  %s1033_s7 = sphi %s1092_s7, %s23_s7   ;;  %s1029_s30 = sphi %s1090_s30, %s1359_s30   ;;  %s1025_s29 = sphi %s1088_s29, %s1358_s29   ;;  %s1021_s28 = sphi %s1086_s28, %s1349_s28   ;;  %s1017_s27 = sphi %s1084_s27, %s1348_s27   ;;  %s1013_s26 = sphi %s1082_s26, %s1357_s26   ;;  %s1009_s25 = sphi %s1080_s25, %s1356_s25   ;;  %s1005_s24 = sphi %s1078_s24, %s1355_s24   ;;  %s1001_s23 = sphi %s1076_s23, %s1354_s23   ;;  %s997_s22 = sphi %s1074_s22, %s1353_s22   ;;  %s993_s21 = sphi %s1072_s21, %s1352_s21  }
   0xd   : > { %1335 = sst [smem:[#allocation18_spill]] %s1029_s30  ;;  %s32_s10 = sadd.s32 1, %s1025_s29 }
   0xe   : > { %s35_s11 = sadd.s32 1, %s1029_s30  ;;  %p33_p0 = scmp.ge.s32.totalorder %s32_s10, 5 }
   0xf   : > { %s39_s12 = smul.u32 5, %s1029_s30  ;;  %s46_s13 = sadd.s32 1, %s1013_s26 }
  0x10   : > { %p53_p1 = scmp.ne.s32.totalorder %s1013_s26, %s1009_s25  ;;  %s1361_s10 = smov (%p33_p0, %s32_s10), 0 }
  0x11   : > { %1336 = sst [smem:[#allocation19_spill]] %s1361_s10  ;;  %s1363_s11 = smov (!%p33_p0, %s35_s11), %s1029_s30 }
  0x12   : > { %s40_s14 = sadd.s32 %s1025_s29, %s39_s12  ;;  %p54_p2 = scmp.eq.s32.totalorder %s1033_s7, 0 }
  0x13   : > { %p37_p3 = scmp.ge.s32.totalorder %s1363_s11, 2  ;;  %p59_p4 = scmp.ne.s32.totalorder %s1009_s25, %s1005_s24 }
  0x14   : > { %p1139_p5 = por %p54_p2, %p53_p1  ;;  %p60_p6 = scmp.eq.s32.totalorder %s711_s8, 0 }
  0x15   : > { %s1365_s11 = smov (%p37_p3, %s1363_s11), 0  ;;  %s171_s17 = sadd.s32 1, %s1001_s23 }
  0x16   : > { %1338 = sst [smem:[#allocation20_spill]] %s1365_s11  ;;  %p1145_p7 = por %p60_p6, %p59_p4 }
  0x17   : > { %s41_s18 = smul.u32 5, %s1365_s11  ;;  %s168_s19 = ssub.s32 %s1029_s30, %s1365_s11 }
  0x18   : > { %p169_p8 = scmp.eq.s32.totalorder %s168_s19, 0  ;;  %p181_p9 = scmp.ne.s32.totalorder %s1001_s23, %s997_s22 }
  0x19   : > { %s42_s20 = sadd.s32 %s41_s18, %s1361_s10  ;;  %p182_p10 = scmp.eq.s32.totalorder %s711_s8, 9 }
  0x1a   : > { %s43_s24 = ssub.s32 %s40_s14, %s42_s20  ;;  %p187_p11 = scmp.ne.s32.totalorder %s997_s22, %s993_s21 }
  0x1b   : > { %p44_p12 = scmp.eq.s32.totalorder %s43_s24, 0  ;;  %p1158_p13 = por %p182_p10, %p181_p9 }
  0x1c   : > { %s1163_s9 = scalar_select %p169_p8, %s1001_s23, %s171_s17  }
  0x1d   : > { %s1166_s29 = scalar_select %p44_p12, %s1013_s26, %s46_s13  }
  0x1e   : > { %1341 = sst [smem:[#allocation21_spill]] %s1163_s9  ;;  %s1342_s6 = sadd.s32 4294967294, %s1033_s7  }
  0x1f   : > { %p188_p0 = scmp.eq.s32.totalorder %s1342_s6, 9  ;;  %p742_p1 = scmp.lt.s32.totalorder %s1033_s7, 10 }
  0x20   : > { %s211_s19 = sand.u32 1, %s1013_s26   ;;  %s716_s20 = sshll.u32 %s40_s14, 3 }
  0x21   : > { %p1172_p2 = por %p188_p0, %p187_p11  ;;  %s715_s18 = sshll.u32 %s211_s19, 3 }
  0x22   : > { %s1344_s1 = sld [smem:[#allocation22_spill]]  ;;  %s215_s17 = scalar_lea.vmem [#allocation4], %s715_s18 }
  0x23   : > { %s225_s9 = sshll.u32 %s215_s17, 4  ;;  %p735_p3 = pnand %p742_p1, %p1139_p5  ;;  %s226_s9 = int_to_ptr.vmem [resolvable:$true] %s225_s9 }
  0x24   : > { %p717_p4 = scmp.ge.s32.totalorder %s1033_s7, 1  ;;  %p230_p6 = scmp.lt.s32.totalorder %s1033_s7, 11 }
  0x25   : > { %s212_s6 = scalar_lea.sflag [#allocation5], %s211_s19 }
  0x26   : > { %p231_p8 = pnand %p717_p4, %p230_p6 }
  0x27   : > { %s236_s13 = sand.u32 (!%p231_p8), 1, %s1009_s25  }
  0x28   : > { %s221_s10 = scalar_lea.hbm %s1344_s1, %s716_s20  ;;  %234 = sbr.rel (%p231_p8) target bundleno = 1197 (0x4ad), region = 28 }
  0x29   : > { %s223_s30 = sshll.u32 %s221_s10, 4  ;;  %s1184_s14 = sshll.u32 (!%p231_p8), %s236_s13, 3  ;;  %s224_s30 = int_to_ptr.hbm [resolvable:$true] %s223_s30 }
  0x2a   : > { %737 = dma.hbm_to_vmem [thread:$0]  (!%p735_p3), %s224_s30, 128, %s226_s9, %s212_s6  }
  0x2b   : > { %s237_s11 = scalar_lea.sflag (!%p231_p8), [#allocation5], %s236_s13 }
  0x2d   : > { %982 = dma.done.wait (%p1145_p7), %s237_s11, 128  }
  0x2e   : > { %984 = vsyncadd (%p1145_p7), %s237_s11, 4294967168  ;;  %s274_s30 = sand.u32 1, %s997_s22   ;;  %p278_p5 = scmp.lt.s32.totalorder %s1021_s28, 1 }
  0x2f   : > { %s287_s9 = smul.u32 5, %s1021_s28  ;;  %s1213_s1 = scalar_lea.vmem [#allocation7], %s274_s30 }
  0x30   : > { %s279_s15 = scalar_select %p278_p5, %s1021_s28, 1 }
  0x31   : > { %s1196_s19 = sadd.s32 %s1017_s27, %s287_s9  ;;  %p719_p7 = scmp.ne.s32.totalorder %s1017_s27, 0 }
  0x32   : > { %s1201_s24 = scalar_lea.vmem %s1323_s3, %s279_s15  ;;  %s1206_s6 = scalar_lea.vmem %s1324_s4, %s279_s15 }
  0x33   : > { %s286_s10 = scalar_lea.vmem %s1325_s5, %s279_s15  ;;  %292 = sbr.rel (%p719_p7) target bundleno = 354 (0x162), region = 36 }
  0x38   : > { %vm293_vm0 = vcmask 0   ;;  %v1035_v0 = vmov 0.0  }
  0x39   : > { %294 = vst.msk [vmem:[%s1201_s24] sm:$0x1] %vm293_vm0, %v1035_v0 }
  0x3a   : > { %295 = vst.msk [vmem:[%s1206_s6] sm:$0x1] %vm293_vm0, %v1035_v0 }
  0x3b   : > { %296 = vst.msk [vmem:[%s286_s10] sm:$0x1] %vm293_vm0, %v1035_v0 }
  0x3c   : > { %s304_s20 = sshll.u32 %s1320_s0, 4  ;;  %s1036_s17 = smov [#allocation8]   ;;  %s305_s20 = int_to_ptr.hbm [resolvable:$true] %s304_s20 }
  0x3d   : > { %s306_s15 = sshll.u32 %s1036_s17, 4  ;;  %s307_s15 = int_to_ptr.vmem [resolvable:$true] %s306_s15 }
  0x3e   : > { %309 = dma.hbm_to_vmem [thread:$0]  %s305_s20, 256, %s307_s15, [#allocation9] }
  0x3f   : > { %985 = dma.done.wait [#allocation9], 256 }
  0x40   : > { %986 = vsyncadd [#allocation9], 4294967040  ;;  %v316_v1 = vld [vmem:[#allocation8 + $0x8] sm:$0xf]  ;;  %v834_v2 = vld [vmem:[%s1322_s2] ss:$0 sm:$0xff] }
  0x41   : > { %vm330_vm1 = vcmask 1043456   ;;  %v314_v3 = vld [vmem:[#allocation8] sm:$0xf]  ;;  %v324_v4 = vsub.f32 %v316_v1, %v834_v2  ;;  %v317_v7 = vld [vmem:[#allocation8 + $0xc] sm:$0xf] }
  0x42   : > { %v322_v5 = vsub.f32 %v314_v3, %v834_v2  ;;  %v455_v6 = vsel %vm330_vm1, %v314_v3, 0.0  ;;  %v315_v8 = vld [vmem:[#allocation8 + $0x4] sm:$0xf]  ;;  %v458_v9 = vsel %vm330_vm1, %v316_v1, 0.0  ;;  %v325_v10 = vsub.f32 %v317_v7, %v834_v2  ;;  %v318_v31 = vld [vmem:[%s1322_s2] sm:$0x1] }
  0x43   : > { %v456_v11 = vsel %vm330_vm1, %v315_v8, 0.0  ;;  %v328_v12 = vmul.f32 16.0, %v324_v4  ;;  %v323_v14 = vsub.f32 %v315_v8, %v834_v2  ;;  %v460_v16 = vsel %vm330_vm1, %v317_v7, 0.0 }
  0x44   : > { %v326_v13 = vmul.f32 16.0, %v322_v5  ;;  %v457_v15 = vadd.f32 %v456_v11, %v455_v6  ;;  %v329_v20 = vmul.f32 16.0, %v325_v10  ;;  %v470_v33 = vmul.f32 0.9, %v318_v31 }
  0x45   : > { %v337_v17 = vsel %vm330_vm1, %v328_v12, -inf  ;;  %v327_v21 = vmul.f32 16.0, %v323_v14 }
  0x46   : > { %v331_v18 = vsel %vm330_vm1, %v326_v13, -inf  ;;  %v459_v19 = vadd.f32 %v458_v9, %v457_v15  ;;  %338 = vmax.xlane.f32.xlu1 %v337_v17  ;;  %v340_v25 = vsel %vm330_vm1, %v329_v20, -inf }
  0x47   : > { %332 = vmax.xlane.f32.xlu0 %v331_v18  ;;  %v334_v26 = vsel %vm330_vm1, %v327_v21, -inf }
  0x48   : > { %v461_v22 = vadd.f32 %v460_v16, %v459_v19 }
  0x4a   : > { %v462_v23 = vsel %vm330_vm1, %v461_v22, 0.0 }
  0x4b   : > { %v463_v24 = vrot.slane %v462_v23, 4 }
  0x4d   : > { %v464_v27 = vadd.f32 %v463_v24, %v462_v23 }
  0x4e   : > { %341 = vmax.xlane.f32.xlu1 %v340_v25 }
  0x4f   : > { %v465_v28 = vrot.slane %v464_v27, 2  ;;  %335 = vmax.xlane.f32.xlu0 %v334_v26 }
  0x51   : > { %v466_v29 = vadd.f32 %v465_v28, %v464_v27 }
  0x53   : > { %v467_v30 = vrot.slane %v466_v29, 1 }
  0x55   : > { %v468_v32 = vadd.f32 %v467_v30, %v466_v29 }
  0x57   : > { %v469_v34 = vmul.f32 0.0625, %v468_v32 }
  0x59   : > { %v471_v35 = vmul.f32 0.1, %v469_v34 }
  0x5b   : > { %v472_v36 = vadd.f32 %v471_v35, %v470_v33 }
  0x5d   : > { %473 = vst [vmem:[%s1213_s1] sm:$0x1] %v472_v36 }
  0xb9   : > { %v339_v37 = vpop.xlane.xlu1 %338 }
  0xba   : > { %v333_v38 = vpop.xlane.xlu0 %332  ;;  %v345_v39 = vsub.f32 %v328_v12, %v339_v37 }
  0xbb   : > { %v343_v40 = vsub.f32 %v326_v13, %v333_v38 }
  0xbc   : > { %v351_v41 = vmul.f32 1.442695, %v345_v39 }
  0xbd   : > { %v347_v42 = vmul.f32 1.442695, %v343_v40 }
  0xbe   : > { %835 = vpow2.f32 %v351_v41 }
  0xbf   : > { %837 = vpow2.f32 %v347_v42 }
  0xc1   : > { %v342_v43 = vpop.xlane.xlu1 %341 }
  0xc2   : > { %v336_v44 = vpop.xlane.xlu0 %335  ;;  %v346_v45 = vsub.f32 %v329_v20, %v342_v43 }
  0xc3   : > { %v344_v46 = vsub.f32 %v327_v21, %v336_v44 }
  0xc4   : > { %v836_v47 = vpop.eup %835  ;;  %v353_v48 = vmul.f32 1.442695, %v346_v45 }
  0xc5   : > { %v349_v49 = vmul.f32 1.442695, %v344_v46  ;;  %v838_v50 = vpop.eup %837  ;;  %v361_v51 = vsel %vm330_vm1, %v836_v47, 0.0 }
  0xc6   : > { %839 = vpow2.f32 %v353_v48  ;;  %362 = vadd.xlane.f32.xlu0 %v361_v51  ;;  %v355_v52 = vsel %vm330_vm1, %v838_v50, 0.0 }
  0xc7   : > { %841 = vpow2.f32 %v349_v49  ;;  %356 = vadd.xlane.f32.xlu2 %v355_v52 }
  0xcc   : > { %v1239_v53 = vpop.eup %839 }
  0xcd   : > { %v1241_v54 = vpop.eup %841  ;;  %v364_v55 = vsel %vm330_vm1, %v1239_v53, 0.0 }
  0xce   : > { %365 = vadd.xlane.f32.xlu1 %v364_v55  ;;  %v358_v56 = vsel %vm330_vm1, %v1241_v54, 0.0 }
  0xcf   : > { %359 = vadd.xlane.f32.xlu2 %v358_v56 }
 0x139   : > { %v363_v57 = vpop.xlane.xlu0 %362 }
 0x13a   : > { %v357_v58 = vpop.xlane.xlu2 %356  ;;  %843 = vrcp.f32 %v363_v57  ;;  %v408_v3 = vand.u32 2147483648, %v363_v57  ;;  %v406_v6 = vand.u32 2147483647, %v363_v57  ;;  %vm402_vm4 = vweird.f32 %v363_v57 }
 0x13b   : > { %845 = vrcp.f32 %v357_v58  ;;  %v378_v4 = vand.u32 2147483648, %v357_v58  ;;  %v376_v8 = vand.u32 2147483647, %v357_v58  ;;  %vm372_vm5 = vweird.f32 %v357_v58 }
 0x13c   : > { %v409_v12 = vor.u32 1.1754944e-38, %v408_v3  ;;  %vm407_vm8 = vcmp.eq.f32.partialorder %v406_v6, 8.507059e+37 }
 0x13d   : > { %v379_v14 = vor.u32 1.1754944e-38, %v378_v4  ;;  %vm377_vm9 = vcmp.eq.f32.partialorder %v376_v8, 8.507059e+37 }
 0x140   : > { %v844_v59 = vpop.eup %843 }
 0x141   : > { %v846_v60 = vpop.eup %845  ;;  %v398_v61 = vmul.f32 %v844_v59, %v363_v57  ;;  %v366_v62 = vpop.xlane.xlu1 %365  ;;  %vm403_vm2 = vweird.f32 %v844_v59 }
 0x142   : > { %v368_v63 = vmul.f32 %v846_v60, %v357_v58  ;;  %847 = vrcp.f32 %v366_v62  ;;  %v360_v0 = vpop.xlane.xlu2 %359  ;;  %vm373_vm3 = vweird.f32 %v846_v60  ;;  %vm404_vm6 = vmor %vm402_vm4, %vm403_vm2  ;;  %v421_v24 = vand.u32 2147483647, %v366_v62 }
 0x143   : > { %v399_v1 = vsub.f32 1.0, %v398_v61  ;;  %849 = vrcp.f32 %v360_v0  ;;  %vm374_vm7 = vmor %vm372_vm5, %vm373_vm3  ;;  %v423_v25 = vand.u32 2147483648, %v366_v62  ;;  %v393_v29 = vand.u32 2147483648, %v360_v0 }
 0x144   : > { %v369_v2 = vsub.f32 1.0, %v368_v63  ;;  %v391_v32 = vand.u32 2147483647, %v360_v0  ;;  %vm417_vm12 = vweird.f32 %v366_v62  ;;  %vm387_vm14 = vweird.f32 %v360_v0 }
 0x145   : > { %v400_v5 = vmul.f32 %v844_v59, %v399_v1  ;;  %v424_v34 = vor.u32 1.1754944e-38, %v423_v25  ;;  %vm422_vm15 = vcmp.eq.f32.partialorder %v421_v24, 8.507059e+37  ;;  %v394_v37 = vor.u32 1.1754944e-38, %v393_v29 }
 0x146   : > { %v370_v7 = vmul.f32 %v846_v60, %v369_v2  ;;  %vm392_vm2 = vcmp.eq.f32.partialorder %v391_v32, 8.507059e+37 }
 0x147   : > { %v401_v9 = vadd.f32 %v844_v59, %v400_v5 }
 0x148   : > { %v848_v10 = vpop.eup %847  ;;  %v371_v11 = vadd.f32 %v846_v60, %v370_v7 }
 0x149   : > { %v850_v13 = vpop.eup %849  ;;  %v405_v15 = vsel %vm404_vm6, %v844_v59, %v401_v9  ;;  %v413_v16 = vmul.f32 %v848_v10, %v366_v62  ;;  %vm418_vm10 = vweird.f32 %v848_v10 }
 0x14a   : > { %v375_v17 = vsel %vm374_vm7, %v846_v60, %v371_v11  ;;  %v410_v18 = vsel %vm407_vm8, %v409_v12, %v405_v15  ;;  %v383_v19 = vmul.f32 %v850_v13, %v360_v0  ;;  %vm388_vm11 = vweird.f32 %v850_v13  ;;  %vm419_vm13 = vmor %vm417_vm12, %vm418_vm10 }
 0x14b   : > { %v380_v20 = vsel %vm377_vm9, %v379_v14, %v375_v17  ;;  %v411_v21 = vmul.f32 %v836_v47, %v410_v18  ;;  %v414_v22 = vsub.f32 1.0, %v413_v16  ;;  %vm389_vm0 = vmor %vm387_vm14, %vm388_vm11 }
 0x14c   : > { %v381_v23 = vmul.f32 %v838_v50, %v380_v20  ;;  %v384_v26 = vsub.f32 1.0, %v383_v19 }
 0x14d   : > { %v447_v27 = vpack.c.bf16 %v411_v21, %v411_v21  ;;  %v415_v28 = vmul.f32 %v848_v10, %v414_v22  ;;  %v430_v49 = vsel %vm330_vm1, %v411_v21, 0.0 }
 0x14e   : > { %v440_v30 = vpack.c.bf16 %v381_v23, %v381_v23  ;;  %v385_v31 = vmul.f32 %v850_v13, %v384_v26  ;;  %v427_v44 = vsel %vm330_vm1, %v381_v23, 0.0 }
 0x14f   : > { %449 = vst [vmem:[#allocation3 + $0x4] sm:$0x3] %v447_v27  ;;  %v416_v33 = vadd.f32 %v848_v10, %v415_v28 }
 0x150   : > { %441 = vst [vmem:[#allocation3] sm:$0x3] %v440_v30  ;;  %v386_v35 = vadd.f32 %v850_v13, %v385_v31 }
 0x151   : > { %v420_v36 = vsel %vm419_vm13, %v848_v10, %v416_v33 }
 0x152   : > { %v425_v38 = vsel %vm422_vm15, %v424_v34, %v420_v36  ;;  %v390_v39 = vsel %vm389_vm0, %v850_v13, %v386_v35 }
 0x153   : > { %v426_v40 = vmul.f32 %v1239_v53, %v425_v38  ;;  %v395_v41 = vsel %vm392_vm2, %v394_v37, %v390_v39 }
 0x154   : > { %v396_v42 = vmul.f32 %v1241_v54, %v395_v41 }
 0x155   : > { %v450_v43 = vpack.c.bf16 %v426_v40, %v426_v40  ;;  %v432_v52 = vsel %vm330_vm1, %v426_v40, 0.0 }
 0x156   : > { %v428_v45 = vsel %vm330_vm1, %v396_v42, 0.0  ;;  %v442_v46 = vpack.c.bf16 %v396_v42, %v396_v42 }
 0x157   : > { %v452_v47 = vrot.slane %v450_v43, 6  ;;  %v429_v48 = vadd.f32 %v428_v45, %v427_v44 }
 0x158   : > { %v444_v50 = vrot.slane %v442_v46, 6 }
 0x159   : > { %454 = vst [vmem:[#allocation3 + $0x4] sm:$0xc] %v452_v47  ;;  %v431_v51 = vadd.f32 %v430_v49, %v429_v48 }
 0x15a   : > { %446 = vst [vmem:[#allocation3] sm:$0xc] %v444_v50 }
 0x15b   : > { %v433_v53 = vadd.f32 %v432_v52, %v431_v51 }
 0x15d   : > { %v434_v55 = vpack.c.bf16 %v433_v53, %v433_v53 }
 0x15f   : > { %435 = vst [vmem:[#allocation2] sm:$0x3] %v434_v55  ;;  %v437_v54 = vrot.slane %v434_v55, 6 }
 0x161   : > { %439 = vst [vmem:[#allocation2] sm:$0xc] %v437_v54 }
 0x162 PF: > { %s1345_s11 = scalar_lea.vmem [#allocation4], %s1184_s14  ;;  %v489_v12 = vld [vmem:[%s1201_s24] sm:$0x1]  ;;  %vm501_vm1 = vcmask 0   ;;  %p720_p9 = scmp.ne.s32.totalorder %s1196_s19, 0 }
 0x163   : > { %v474_v56 = vld [vmem:[%s1345_s11] sm:$0xff] }
 0x164   : > { %v475_v57 = vmul.f32 10.0, %v474_v56 }
 0x166   : > { %476 = vmax.xlane.f32.xlu0 %v475_v57 }
 0x168   : > { %v486_v63 = vld [vmem:[#allocation2] sm:$0xf] }
 0x169   : > { %v487_v2 = vunpack.c.l.bf16 %v486_v63 }
 0x1d9   : > { %v477_v58 = vpop.xlane.xlu0 %476 }
 0x1da   : > { %v478_v59 = vsub.f32 %v475_v57, %v477_v58 }
 0x1dc   : > { %v479_v60 = vmul.f32 1.442695, %v478_v59 }
 0x1de   : > { %851 = vpow2.f32 %v479_v60 }
 0x1e4   : > { %v852_v61 = vpop.eup %851 }
 0x1e5   : > { %481 = vadd.xlane.f32.xlu0 %v852_v61 }
 0x258   : > { %v482_v62 = vpop.xlane.xlu0 %481 }
 0x259   : > { %853 = vlog2.f32 %v482_v62 }
 0x25f   : > { %v854_v0 = vpop.eup %853 }
 0x260   : > { %v484_v1 = vmul.f32 0.6931472, %v854_v0 }
 0x262   : > { %v485_v3 = vsub.f32 %v478_v59, %v484_v1 }
 0x264   : > { %v488_v4 = vmul.f32 %v487_v2, %v485_v3 }
 0x266   : > { %490 = vadd.xlane.f32.xlu1 %v488_v4 }
 0x2d9   : > { %v491_v5 = vpop.xlane.xlu1 %490 }
 0x2da   : > { %v492_v6 = vrot.slane %v491_v5, 4 }
 0x2dc   : > { %v493_v7 = vadd.f32 %v492_v6, %v491_v5 }
 0x2de   : > { %v494_v8 = vrot.slane %v493_v7, 2 }
 0x2e0   : > { %v495_v9 = vadd.f32 %v494_v8, %v493_v7 }
 0x2e2   : > { %v496_v10 = vrot.slane %v495_v9, 1 }
 0x2e4   : > { %v497_v11 = vadd.f32 %v496_v10, %v495_v9 }
 0x2e6   : > { %724 = vpush %v497_v11 }
 0x317   : > { %s725_s14 = spop %724  ;;  %506 = sbr.rel (%p720_p9) target bundleno = 983 (0x3d7), region = 46 }
 0x318   : > { %v499_v13 = vstv %s725_s14 }
 0x319   : > { %v500_v14 = vadd.f32 %v499_v13, %v489_v12 }
 0x31b   : > { %502 = vst.msk [vmem:[%s1201_s24] sm:$0x1] %vm501_vm1, %v500_v14 }
 0x31c   : > { %v507_v15 = vld [vmem:[#allocation3] sm:$0xf]  ;;  %v509_v25 = vld [vmem:[%s1206_s6] sm:$0x1] }
 0x31d   : > { %v508_v16 = vunpack.c.l.bf16 %v507_v15 }
 0x31f   : > { %v510_v17 = vmul.f32 %v508_v16, %v485_v3 }
 0x321   : > { %511 = vadd.xlane.f32.xlu0 %v510_v17 }
 0x394   : > { %v512_v18 = vpop.xlane.xlu0 %511 }
 0x395   : > { %v513_v19 = vrot.slane %v512_v18, 4 }
 0x397   : > { %v514_v20 = vadd.f32 %v513_v19, %v512_v18 }
 0x399   : > { %v515_v21 = vrot.slane %v514_v20, 2 }
 0x39b   : > { %v516_v22 = vadd.f32 %v515_v21, %v514_v20 }
 0x39d   : > { %v517_v23 = vrot.slane %v516_v22, 1 }
 0x39f   : > { %v518_v24 = vadd.f32 %v517_v23, %v516_v22 }
 0x3a1   : > { %726 = vpush %v518_v24 }
 0x3d2   : > { %s727_s9 = spop %726 }
 0x3d3   : > { %v520_v26 = vstv %s727_s9 }
 0x3d4   : > { %v521_v27 = vadd.f32 %v520_v26, %v509_v25 }
 0x3d6   : > { %522 = vst.msk [vmem:[%s1206_s6] sm:$0x1] %vm501_vm1, %v521_v27 }
 0x3d7 PF: > { %p721_p10 = scmp.ne.s32.totalorder %s1196_s19, 1 }
 0x3d9   : > { %526 = sbr.rel (%p721_p10) target bundleno = 1177 (0x499), region = 50 }
 0x3de   : > { %v528_v28 = vld [vmem:[#allocation3 + $0x4] sm:$0xf]  ;;  %v530_v38 = vld [vmem:[%s1206_s6] sm:$0x1] }
 0x3df   : > { %v529_v29 = vunpack.c.l.bf16 %v528_v28 }
 0x3e1   : > { %v531_v30 = vmul.f32 %v529_v29, %v485_v3 }
 0x3e3   : > { %532 = vadd.xlane.f32.xlu0 %v531_v30 }
 0x456   : > { %v533_v31 = vpop.xlane.xlu0 %532 }
 0x457   : > { %v534_v32 = vrot.slane %v533_v31, 4 }
 0x459   : > { %v535_v33 = vadd.f32 %v534_v32, %v533_v31 }
 0x45b   : > { %v536_v34 = vrot.slane %v535_v33, 2 }
 0x45d   : > { %v537_v35 = vadd.f32 %v536_v34, %v535_v33 }
 0x45f   : > { %v538_v36 = vrot.slane %v537_v35, 1 }
 0x461   : > { %v539_v37 = vadd.f32 %v538_v36, %v537_v35 }
 0x463   : > { %728 = vpush %v539_v37 }
 0x494   : > { %s729_s24 = spop %728 }
 0x495   : > { %v541_v39 = vstv %s729_s24 }
 0x496   : > { %v542_v40 = vadd.f32 %v541_v39, %v530_v38 }
 0x498   : > { %543 = vst.msk [vmem:[%s1206_s6] sm:$0x1] %vm501_vm1, %v542_v40 }
 0x499 PF: > { %s1346_s20 = sld [smem:[#allocation23_spill]]  ;;  %s573_s15 = sshll.u32 %s1213_s1, 4  ;;  %s574_s15 = int_to_ptr.vmem [resolvable:$true] %s573_s15 }
 0x49a   : > { %s554_s16 = scalar_lea.sflag [#allocation6], %s274_s30 }
 0x49f   : > { %s571_s17 = scalar_lea.hbm %s1346_s20, %s1021_s28  ;;  %s929_s14 = scalar_lea.hbm %s1346_s20, 2 }
 0x4a0   : > { %s575_s27 = sshll.u32 %s571_s17, 4  ;;  %s576_s27 = int_to_ptr.hbm [resolvable:$true] %s575_s27 }
 0x4a1   : > { %s923_s10 = sshra.s32 %s576_s27, 4  ;;  %s924_s10 = int_to_ptr.hbm [resolvable:$true] %s923_s10 }
 0x4a2   : > { %s925_s13 = scalar_lea.hbm %s924_s10, 1  ;;  %p930_p1 = scmp.lt.s32.totalorder %s924_s10, %s1346_s20 }
 0x4a3   : > { %p926_p11 = scmp.ne.s32.totalorder %s924_s10, %s925_s13  ;;  %p931_p3 = scmp.lt.s32.totalorder %s929_s14, %s925_s13 }
 0x4a5   : > { %p927_p12 = pnand %p926_p11, %p1158_p13  ;;  %p932_p4 = por %p931_p3, %p930_p1 }
 0x4a7   : > { %p928_p0 = pneg %p927_p12 }
 0x4a9   : > { %p933_p6 = pnand %p932_p4, %p928_p0 }
 0x4ab   : > { %936 = shalt.err (!%p933_p6)
}
 0x4ac   : > { %732 = dma.vmem_to_hbm [thread:$0]  (%p1158_p13), %s574_s15, 16, %s576_s27, %s554_s16  }
 0x4ad PF: > { %p743_p8 = scmp.ge.s32.totalorder %s1033_s7, 2  ;;  %s605_s1 = sand.u32 1, %s993_s21  }
 0x4ae   : > { %s606_s28 = scalar_lea.sflag [#allocation6], %s605_s1 }
 0x4af   : > { %p739_p5 = pnand %p743_p8, %p1172_p2 }
 0x4b1   : > { %p740_p7 = pneg %p739_p5 }
 0x4b3   : > { %988 = dma.done.wait (%p740_p7), %s606_s28, 16  }
 0x4b4   : > { %990 = vsyncadd (%p740_p7), %s606_s28, 4294967280  ;;  %s23_s7 = sadd.s32 1, %s1033_s7   ;;  %s1347_s30 = sld [smem:[#allocation21_spill]] }
 0x4b5   : > { %p20_p9 = scmp.ge.s32.totalorder %s23_s7, 12   ;;  %s1348_s27 = sld [smem:[#allocation17_spill]] }
 0x4b6   : > { %s1349_s28 = sld [smem:[#allocation18_spill]]  ;;  %s1352_s21 = smov %s997_s22 }
 0x4b7   : > { %s1350_s12 = sld [smem:[#allocation19_spill]]  ;;  %s1353_s22 = smov %s1001_s23 }
 0x4b8   : > { %s1351_s19 = sld [smem:[#allocation20_spill]]  ;;  %s1355_s24 = smov %s1009_s25 }
 0x4b9   : > { %s1356_s25 = smov %s1013_s26  ;;  %s1357_s26 = smov %s1166_s29 }
 0x4ba   : > { %s1354_s23 = smov %s1347_s30  ;;  %22 = sbr.rel (!%p20_p9) target bundleno = 12 (0xc), region = 129 }
 0x4bd   : > { %s1358_s29 = smov %s1350_s12 }
 0x4be   : > { %s1359_s30 = smov %s1351_s19 }
 0x4bf   :  { %611 = vsyncpa [#allocation5], 1 }
 0x4c0   :  { %613 = vsyncpa [#allocation5 + $0x1], 1 }
 0x4c1   :  { %614 = vsyncpa [#allocation6], 1 }
 0x4c2   :  { %616 = vsyncpa [#allocation6 + $0x1], 1 }

</bundles_post_ra>
